<compile_context>
chip_gen: v5e
topology: v5e:2x2
jax: 0.10.0
libtpu: 0.0.40
codegen_flags: <defaults>
</compile_context>

<pallas_src>
import jax
import jax.numpy as jnp
from jax.experimental import pallas as pl
from jax.experimental.pallas import tpu as pltpu

IN_F = 49
H1 = 128
H2 = 128


def tab_encoder_kernel(x_ref, w1_ref, b1_ref, w2_ref, b2_ref, o_ref):
    # l1 + ReLU   (Dropout(0.5) == identity in eval mode)
    h = jnp.dot(x_ref[...], w1_ref[...],
                preferred_element_type=jnp.float32) + b1_ref[...]
    h = jnp.maximum(h, 0.0)
    # l2 (cast h back to the weight dtype so bf16 streaming keeps a
    # single-pass bf16 MXU matmul; accumulation stays f32)
    o_ref[...] = (jnp.dot(h.astype(w2_ref.dtype), w2_ref[...],
                          preferred_element_type=jnp.float32)
                  + b2_ref[...]).astype(o_ref.dtype)


def tab_encoder_forward(t, params, *, batch_tile=2048, stream_bf16=False,
                        small_batch_threshold=256, force_kernel=False):
    """t: (B, 49) float32 tabular features -> (B, 128)."""
    B, F = t.shape
    assert F == IN_F
    w1, b1, w2, b2 = params

    # Tiny batches: custom-call + single-step pipeline overhead dwarfs the
    # work; let XLA fuse the two GEMMs instead.
    if (not force_kernel) and B < small_batch_threshold:
        h = jnp.maximum(t @ w1 + b1, 0.0)
        return h @ w2 + b2

    if stream_bf16:
        # Stream x / out (and keep resident weights) in bf16; biases and the
        # MXU accumulation stay f32.
        t = t.astype(jnp.bfloat16)
        w1 = w1.astype(jnp.bfloat16)
        w2 = w2.astype(jnp.bfloat16)
        out_dtype = jnp.bfloat16
    else:
        out_dtype = jnp.float32

    # ---- batch tile selection ------------------------------------------
    B8 = max(8, ((B + 7) // 8) * 8)          # sublane-multiple batch
    tb = min(batch_tile, B8)
    # Keep >= 2 grid steps when there is enough work (v7x megacore sharding
    # of the "parallel" batch axis + DMA/compute overlap).
    if B8 >= 2048:
        tb = min(tb, max(8, (B8 // 2 // 8) * 8))
    tb = max(8, (tb // 8) * 8)                # multiple of 8 sublanes
    Bp = ((B8 + tb - 1) // tb) * tb           # pad batch to a tile multiple
    if Bp != B:
        t = jnp.pad(t, ((0, Bp - B), (0, 0)))

    grid = (Bp // tb,)

    elem = 2 if stream_bf16 else 4
    flops = 2 * Bp * (IN_F * H1 + H1 * H2)
    bytes_accessed = (elem * (Bp * IN_F + w1.size + w2.size + Bp * H2)
                      + 4 * (b1.size + b2.size))

    out = pl.pallas_call(
        tab_encoder_kernel,
        out_shape=jax.ShapeDtypeStruct((Bp, H2), out_dtype),
        grid_spec=pltpu.PrefetchScalarGridSpec(
            num_scalar_prefetch=0,
            grid=grid,
            in_specs=[
                # streamed batch tile of the input (49 features stay unpadded
                # in HBM; lane padding happens only in VMEM)
                pl.BlockSpec((tb, IN_F), lambda i: (i, 0)),
                # parameters: constant block index -> fetched once, resident
                pl.BlockSpec((IN_F, H1), lambda i: (0, 0)),
                pl.BlockSpec((1, H1), lambda i: (0, 0)),
                pl.BlockSpec((H1, H2), lambda i: (0, 0)),
                pl.BlockSpec((1, H2), lambda i: (0, 0)),
            ],
            out_specs=pl.BlockSpec((tb, H2), lambda i: (i, 0)),
        ),
        compiler_params=pltpu.CompilerParams(
            dimension_semantics=("parallel",),
            vmem_limit_bytes=32 * 1024 * 1024,
        ),
        cost_estimate=pl.CostEstimate(
            flops=flops, transcendentals=0, bytes_accessed=bytes_accessed),
    )(t, w1, b1, w2, b2)
    return out[:B]


def init_params(key):
    """PyTorch-style Linear init; weights stored as (in, out) so the kernel
    computes y = x @ W + b (== PyTorch x @ W_t.T + b)."""
    k1, k2, k3, k4 = jax.random.split(key, 4)

    def lin(kw, kb, fan_in, fan_out):
        bound = 1.0 / jnp.sqrt(fan_in)
        w = jax.random.uniform(kw, (fan_in, fan_out), jnp.float32, -bound, bound)
        b = jax.random.uniform(kb, (1, fan_out), jnp.float32, -bound, bound)
        return w, b

    w1, b1 = lin(k1, k2, IN_F, H1)
    w2, b2 = lin(k3, k4, H1, H2)
    return (w1, b1, w2, b2)


def reference_forward(t, params):
    w1, b1, w2, b2 = params
    h = jnp.maximum(t @ w1 + b1, 0.0)   # l1 + ReLU (dropout = identity)
    return h @ w2 + b2                   # l2


if __name__ == "__main__":
    key = jax.random.PRNGKey(0)
    kx, kx2, kp = jax.random.split(key, 3)
    params = init_params(kp)

    # 1) Small-batch check (forces the kernel path; module-sized example).
    B = 2
    t_small = jax.random.normal(kx, (B, IN_F), jnp.float32)
    out_small = jax.block_until_ready(
        tab_encoder_forward(t_small, params, force_kernel=True))
    ref_small = reference_forward(t_small, params)
    assert out_small.shape == (B, H2)
    assert jnp.allclose(out_small, ref_small, atol=1e-4, rtol=1e-4)

    # 2) Larger batch exercising the multi-step tiled grid (>= 2 grid steps).
    B2 = 4096
    t_big = jax.random.normal(kx2, (B2, IN_F), jnp.float32)
    out_big = jax.block_until_ready(tab_encoder_forward(t_big, params))
    ref_big = reference_forward(t_big, params)
    assert out_big.shape == (B2, H2)
    assert jnp.allclose(out_big, ref_big, atol=1e-4, rtol=1e-4)

    print("KERNEL_OK")
</pallas_src>

<mosaic_0001>
module attributes {stable_mosaic.version = 11 : i64} {
  func.func @tab_encoder_kernel(%arg0: i32, %arg1: memref<8x49xf32, #tpu.memory_space<vmem>>, %arg2: memref<49x128xf32, #tpu.memory_space<vmem>>, %arg3: memref<1x128xf32, #tpu.memory_space<vmem>>, %arg4: memref<128x128xf32, #tpu.memory_space<vmem>>, %arg5: memref<1x128xf32, #tpu.memory_space<vmem>>, %arg6: memref<8x128xf32, #tpu.memory_space<vmem>>) attributes {dimension_semantics = [#tpu.dimension_semantics<parallel>], iteration_bounds = array<i64: 1>, scalar_prefetch = 0 : i64, scratch_operands = 0 : i64, tpu.core_type = #tpu.core_type<tc>, window_params = [{transform_indices = @transform_0, window_bounds = array<i64: 8, 49>}, {pipeline_mode = #tpu.pipeline_mode<synchronous>, transform_indices = @transform_1, window_bounds = array<i64: 49, 128>}, {pipeline_mode = #tpu.pipeline_mode<synchronous>, transform_indices = @transform_2, window_bounds = array<i64: 1, 128>}, {pipeline_mode = #tpu.pipeline_mode<synchronous>, transform_indices = @transform_3, window_bounds = array<i64: 128, 128>}, {pipeline_mode = #tpu.pipeline_mode<synchronous>, transform_indices = @transform_4, window_bounds = array<i64: 1, 128>}, {transform_indices = @transform_5, window_bounds = array<i64: 8, 128>}]} {
    %c0 = arith.constant 0 : index
    %c0_0 = arith.constant 0 : index
    %0 = vector.load %arg1[%c0, %c0_0] : memref<8x49xf32, #tpu.memory_space<vmem>>, vector<8x49xf32>
    %c0_1 = arith.constant 0 : index
    %c0_2 = arith.constant 0 : index
    %1 = vector.load %arg2[%c0_1, %c0_2] : memref<49x128xf32, #tpu.memory_space<vmem>>, vector<49x128xf32>
    %cst = arith.constant dense<0.000000e+00> : vector<8x128xf32>
    %2 = tpu.matmul %0, %1, %cst {dimension_numbers = #tpu.dot_dimension_numbers<[1], [0], [0], [1], [0, 0, 1, 1], [], []>} : vector<8x49xf32>, vector<49x128xf32>, vector<8x128xf32> -> vector<8x128xf32>
    %c0_3 = arith.constant 0 : index
    %c0_4 = arith.constant 0 : index
    %3 = vector.load %arg3[%c0_3, %c0_4] : memref<1x128xf32, #tpu.memory_space<vmem>>, vector<1x128xf32>
    %4 = vector.broadcast %3 : vector<1x128xf32> to vector<8x128xf32>
    %5 = arith.addf %2, %4 : vector<8x128xf32>
    %cst_5 = arith.constant 0.000000e+00 : f32
    %6 = vector.broadcast %cst_5 : f32 to vector<8x128xf32>
    %7 = arith.maximumf %5, %6 : vector<8x128xf32>
    %c0_6 = arith.constant 0 : index
    %c0_7 = arith.constant 0 : index
    %8 = vector.load %arg4[%c0_6, %c0_7] : memref<128x128xf32, #tpu.memory_space<vmem>>, vector<128x128xf32>
    %cst_8 = arith.constant dense<0.000000e+00> : vector<8x128xf32>
    %9 = tpu.matmul %7, %8, %cst_8 {dimension_numbers = #tpu.dot_dimension_numbers<[1], [0], [0], [1], [0, 0, 1, 1], [], []>} : vector<8x128xf32>, vector<128x128xf32>, vector<8x128xf32> -> vector<8x128xf32>
    %c0_9 = arith.constant 0 : index
    %c0_10 = arith.constant 0 : index
    %10 = vector.load %arg5[%c0_9, %c0_10] : memref<1x128xf32, #tpu.memory_space<vmem>>, vector<1x128xf32>
    %11 = vector.broadcast %10 : vector<1x128xf32> to vector<8x128xf32>
    %12 = arith.addf %9, %11 : vector<8x128xf32>
    %c0_11 = arith.constant 0 : index
    %c0_12 = arith.constant 0 : index
    %13 = vector.load %arg6[%c0_11, %c0_12] : memref<8x128xf32, #tpu.memory_space<vmem>>, vector<8x128xf32>
    tpu.vector_store %arg6[%c0_11, %c0_12], %12 {strides = array<i32>} : memref<8x128xf32, #tpu.memory_space<vmem>>, vector<8x128xf32>,
    return
  }
  func.func @transform_0(%arg0: i32) -> (i32, i32) {
    %c0_i32 = arith.constant 0 : i32
    %c0_i32_0 = arith.constant 0 : i32
    return %arg0, %c0_i32 : i32, i32
  }
  func.func @transform_1(%arg0: i32) -> (i32, i32) {
    %c0_i32 = arith.constant 0 : i32
    %c0_i32_0 = arith.constant 0 : i32
    %c0_i32_1 = arith.constant 0 : i32
    return %c0_i32, %c0_i32_0 : i32, i32
  }
  func.func @transform_2(%arg0: i32) -> (i32, i32) {
    %c0_i32 = arith.constant 0 : i32
    %c0_i32_0 = arith.constant 0 : i32
    %c0_i32_1 = arith.constant 0 : i32
    return %c0_i32, %c0_i32_0 : i32, i32
  }
  func.func @transform_3(%arg0: i32) -> (i32, i32) {
    %c0_i32 = arith.constant 0 : i32
    %c0_i32_0 = arith.constant 0 : i32
    %c0_i32_1 = arith.constant 0 : i32
    return %c0_i32, %c0_i32_0 : i32, i32
  }
  func.func @transform_4(%arg0: i32) -> (i32, i32) {
    %c0_i32 = arith.constant 0 : i32
    %c0_i32_0 = arith.constant 0 : i32
    %c0_i32_1 = arith.constant 0 : i32
    return %c0_i32, %c0_i32_0 : i32, i32
  }
  func.func @transform_5(%arg0: i32) -> (i32, i32) {
    %c0_i32 = arith.constant 0 : i32
    %c0_i32_0 = arith.constant 0 : i32
    return %arg0, %c0_i32 : i32, i32
  }
}

</mosaic_0001>

<bundles_post_ra>
// kernel: tpu_custom_call.1
= control target key start
LH: loop header
LB: loop body
LE: loop exit
PB: predicated region body
PF: predicated region fallthrough
CT: control target
= control target key end

     0   :  { %10 = vsyncpa [#allocation3], 0  ;;  %s332_s0 = inlined_call_operand.hbm [shape: f32[8,49], index: 0, kind: input, shape index: {}]   ;;  %s333_s1 = inlined_call_operand.hbm [shape: f32[49,128], index: 1, kind: input, shape index: {}]   ;;  %s334_s2 = inlined_call_operand.vmem [shape: f32[1,128], index: 2, kind: input, shape index: {}]   ;;  %s335_s3 = inlined_call_operand.hbm [shape: f32[128,128], index: 3, kind: input, shape index: {}]   ;;  %s336_s4 = inlined_call_operand.vmem [shape: f32[1,128], index: 4, kind: input, shape index: {}]   ;;  %s337_s5 = inlined_call_operand.hbm [shape: f32[8,128], index: 5, kind: output, shape index: {}]  }
   0x1   :  { %11 = vsyncpa [#allocation6], 0  ;;  %s28_s20 = sshll.u32 %s333_s1, 4  ;;  %s29_s20 = int_to_ptr.hbm [resolvable:$true] %s28_s20 }
   0x2   :  { %12 = vsyncpa [#allocation4], 0  ;;  %s278_s21 = smov [#allocation5]   ;;  %s18_s25 = sshll.u32 %s332_s0, 4  ;;  %s19_s25 = int_to_ptr.hbm [resolvable:$true] %s18_s25 }
   0x3   :  { %s30_s22 = sshll.u32 %s278_s21, 4  ;;  %s279_s26 = smov 128   ;;  %s31_s22 = int_to_ptr.vmem [resolvable:$true] %s30_s22 }
   0x4   :  { %s280_s27 = smov 8   ;;  %s281_s28 = smov [#allocation2]  }
   0x5   :  { %36 = dma.hbm_to_vmem [thread:$0]  %s29_s20, 896, %s31_s22, [#allocation6], %s279_s26, %s279_s26, %s280_s27  }
   0x6   :  { %s20_s29 = sshll.u32 %s281_s28, 4  ;;  %s43_s7 = sshll.u32 %s335_s3, 4  ;;  %s21_s29 = int_to_ptr.vmem [resolvable:$true] %s20_s29  ;;  %s44_s7 = int_to_ptr.hbm [resolvable:$true] %s43_s7 }
   0x7   :  { %23 = dma.hbm_to_vmem [thread:$0]  %s19_s25, 128, %s21_s29, [#allocation3]  }
   0x8   :  { %s282_s1 = smov [#allocation7]  }
   0x9   :  { %s45_s8 = sshll.u32 %s282_s1, 4  ;;  %s46_s8 = int_to_ptr.vmem [resolvable:$true] %s45_s8 }
   0xa   :  { %51 = dma.hbm_to_vmem [thread:$0]  %s44_s7, 2048, %s46_s8, [#allocation6], %s279_s26, %s279_s26, %s280_s27  }
   0xb   :  { %272 = dma.done.wait [#allocation3], 128  }
   0xc   :  { %273 = vsyncadd [#allocation3], 4294967168 }
   0xd   :  { %274 = dma.done.wait [#allocation6], 2944  }
   0xe   :  { %275 = vsyncadd [#allocation6], 4294964352  ;;  %vm82_vm0 = vcmask 1040384   ;;  %v73_v0 = vld [vmem:[#allocation5 + $0x30] sm:$0x1]  ;;  %v72_v1 = vld [vmem:[#allocation5 + $0x28] sm:$0xff] }
   0xf   :  { %166 = vmatpush.msk.msra.mxu0 %vm82_vm0, %v73_v0  ;;  %v71_v2 = vld [vmem:[#allocation5 + $0x20] sm:$0xff]  ;;  %v122_v3 = vld [vmem:[#allocation7 + $0x78] sm:$0xff]  ;;  %v121_v4 = vld [vmem:[#allocation7 + $0x70] sm:$0xff]  ;;  %vm78_vm1 = vcmask 400384   ;;  %s283_s11 = smov [#allocation8]   ;;  %s155_s15 = sshll.u32 %s337_s5, 4  ;;  %s156_s15 = int_to_ptr.hbm [resolvable:$true] %s155_s15 }
  0x10   :  { %127 = vmatpush.msra.mxu1 %v122_v3  ;;  %v70_v5 = vld [vmem:[#allocation5 + $0x18] sm:$0xff]  ;;  %v120_v6 = vld [vmem:[#allocation7 + $0x68] sm:$0xff]  ;;  %v69_v7 = vld [vmem:[#allocation5 + $0x10] sm:$0xff]  ;;  %s153_s12 = sshll.u32 %s283_s11, 4  ;;  %s154_s12 = int_to_ptr.vmem [resolvable:$true] %s153_s12 }
  0x11   :  { %96 = vmatpush.msra.mxu0 %v72_v1  ;;  %v119_v8 = vld [vmem:[#allocation7 + $0x60] sm:$0xff]  ;;  %v68_v9 = vld [vmem:[#allocation5 + $0x8] sm:$0xff]  ;;  %v118_v10 = vld [vmem:[#allocation7 + $0x58] sm:$0xff] }
  0x12   :  { %128 = vmatpush.msra.mxu1 %v121_v4  ;;  %v67_v11 = vld [vmem:[#allocation5] sm:$0xff]  ;;  %v117_v12 = vld [vmem:[#allocation7 + $0x50] sm:$0xff]  ;;  %v66_v13 = vld [vmem:[#allocation2] sm:$0xff] }
  0x13   :  { %97 = vmatpush.msra.mxu0 %v71_v2  ;;  %v116_v14 = vld [vmem:[#allocation7 + $0x48] sm:$0xff]  ;;  %v115_v15 = vld [vmem:[#allocation7 + $0x40] sm:$0xff]  ;;  %v114_v16 = vld [vmem:[#allocation7 + $0x38] sm:$0xff] }
  0x14   :  { %129 = vmatpush.msra.mxu1 %v120_v6  ;;  %v113_v17 = vld [vmem:[#allocation7 + $0x30] sm:$0xff]  ;;  %v112_v18 = vld [vmem:[#allocation7 + $0x28] sm:$0xff]  ;;  %v111_v19 = vld [vmem:[#allocation7 + $0x20] sm:$0xff] }
  0x15   :  { %98 = vmatpush.msra.mxu0 %v70_v5  ;;  %v110_v20 = vld [vmem:[#allocation7 + $0x18] sm:$0xff]  ;;  %v109_v21 = vld [vmem:[#allocation7 + $0x10] sm:$0xff]  ;;  %v108_v22 = vld [vmem:[#allocation7 + $0x8] sm:$0xff] }
  0x16   :  { %130 = vmatpush.msra.mxu1 %v119_v8  ;;  %v107_v23 = vld [vmem:[#allocation7] sm:$0xff] }
  0x17   :  { %99 = vmatpush.msra.mxu0 %v69_v7  ;;  %v174_v24 = vld [vmem:[%s334_s2] ss:$0 sm:$0xff] }
  0x18   :  { %131 = vmatpush.msra.mxu1 %v118_v10  ;;  %v175_v28 = vld [vmem:[%s336_s4] ss:$0 sm:$0xff] }
  0x19   :  { %100 = vmatpush.msra.mxu0 %v68_v9 }
  0x1a   :  { %132 = vmatpush.msra.mxu1 %v117_v12 }
  0x1b   :  { %101 = vmatpush.msra.mxu0 %v67_v11 }
  0x1c   :  { %167 = vmatmul.msk.f32.vlgmr.msra.gmra.mxu0 %vm78_vm1, %v66_v13  ;;  %133 = vmatpush.msra.mxu1 %v116_v14 }
  0x1e   :  { %134 = vmatpush.msra.mxu1 %v115_v15 }
  0x20   :  { %135 = vmatpush.msra.mxu1 %v114_v16 }
  0x22   :  { %136 = vmatpush.msra.mxu1 %v113_v17 }
  0x24   :  { %137 = vmatpush.msra.mxu1 %v112_v18 }
  0x26   :  { %138 = vmatpush.msra.mxu1 %v111_v19 }
  0x28   :  { %139 = vmatpush.msra.mxu1 %v110_v20 }
  0x2a   :  { %140 = vmatpush.msra.mxu1 %v109_v21 }
  0x2c   :  { %141 = vmatpush.msra.mxu1 %v108_v22 }
  0x2e   :  { %142 = vmatpush.msra.mxu1 %v107_v23 }
  0x99   :  { %v103_v25 = vpop.f32.mrf.mxu0 }
  0x9a   :  { %v104_v26 = vadd.f32 %v174_v24, %v103_v25 }
  0x9c   :  { %v106_v27 = vmax.f32 %v104_v26, 0.0 }
  0x9e   :  { %143 = vmatmul.f32.vlgmr.msra.gmra.mxu1 %v106_v27 }
 0x11b   :  { %v144_v29 = vpop.f32.mrf.mxu1 }
 0x11c   :  { %v145_v30 = vadd.f32 %v175_v28, %v144_v29 }
 0x11e   :  { %147 = vst [vmem:[#allocation8] sm:$0xff] %v145_v30 }
 0x11f   :  { %158 = dma.vmem_to_hbm [thread:$0]  %s154_s12, 128, %s156_s15, [#allocation4]  }
 0x120   :  { %276 = dma.done.wait [#allocation4], 128  }
 0x121   :  { %277 = vsyncadd [#allocation4], 4294967168 }
 0x122   :  { %163 = vsyncpa [#allocation3], 1 }
 0x123   :  { %164 = vsyncpa [#allocation6], 1 }
 0x124   :  { %165 = vsyncpa [#allocation4], 1 }

</bundles_post_ra>
